<compile_context>
chip_gen: v5e
topology: v5e:2x2
jax: 0.10.0
libtpu: 0.0.40
codegen_flags: <defaults>
</compile_context>

<pallas_src>
import functools
import math

import jax
import jax.numpy as jnp
from jax.experimental import pallas as pl
from jax.experimental.pallas import tpu as pltpu


# ------------------------------------------------------------------ kernels


def _mean_mid_kernel(x_ref, o_ref, acc_ref, *, inv_n):
    """Reduce the middle axis of an [outer, R, inner] tile.  grid = (o, i, r)."""
    r = pl.program_id(2)

    @pl.when(r == 0)
    def _():
        acc_ref[...] = jnp.zeros_like(acc_ref)

    # (tile_o, tile_r, tile_i) -> (tile_o, tile_i); sublane reduction (XLU).
    acc_ref[...] += jnp.sum(x_ref[...].astype(jnp.float32), axis=1)

    @pl.when(r == pl.num_programs(2) - 1)
    def _():
        o_ref[...] = (acc_ref[...] * jnp.float32(inv_n)).astype(o_ref.dtype)


def _mean_last_kernel(x_ref, o_ref, acc_ref, *, inv_n):
    """Reduce the last (lane) axis of an [M, R] tile.  grid = (m, r)."""
    r = pl.program_id(1)

    @pl.when(r == 0)
    def _():
        acc_ref[...] = jnp.zeros_like(acc_ref)

    acc_ref[...] += jnp.sum(x_ref[...].astype(jnp.float32), axis=-1, keepdims=True)

    @pl.when(r == pl.num_programs(1) - 1)
    def _():
        o_ref[...] = (acc_ref[...] * jnp.float32(inv_n)).astype(o_ref.dtype)


# ------------------------------------------------------------------ wrapper


def _pick_tile(dim, max_tile, multiple):
    """Largest tile <= max_tile that divides `dim` exactly and is a multiple of
    `multiple`; falls back to the full dim (always a legal block shape)."""
    if dim <= max_tile:
        return dim
    t = (max_tile // multiple) * multiple
    while t >= multiple:
        if dim % t == 0:
            return t
        t -= multiple
    return dim


def mean_pallas(x, axis):
    """Pallas equivalent of torch.Tensor.mean(axis=axis) (no keepdim)."""
    if isinstance(axis, (tuple, list)):
        # Mean over several axes == sequential means (highest axis first).
        out = x
        for a in sorted((a % x.ndim for a in axis), reverse=True):
            out = mean_pallas(out, a)
        return out

    ndim = x.ndim
    ax = axis % ndim
    shape = x.shape
    R = shape[ax]
    out_shape_full = shape[:ax] + shape[ax + 1:]
    inv_n = 1.0 / R

    itemsize = jnp.dtype(x.dtype).itemsize
    budget_elems = (2 * 1024 * 1024) // itemsize  # ~2 MiB per input tile

    if ax == ndim - 1:
        # ---- reduced axis is the minor (lane) axis: flatten to [M, R] ------
        M = math.prod(shape[:-1]) if ndim > 1 else 1
        x2 = x.reshape(M, R)

        tile_r = _pick_tile(R, 2048, 128)
        max_m = max(8, min(1024, budget_elems // max(tile_r, 1)))
        tile_m = _pick_tile(M, max_m, 8)

        grid = (M // tile_m, R // tile_r)
        kernel = functools.partial(_mean_last_kernel, inv_n=inv_n)

        out2 = pl.pallas_call(
            kernel,
            out_shape=jax.ShapeDtypeStruct((M, 1), x.dtype),
            grid_spec=pltpu.PrefetchScalarGridSpec(
                num_scalar_prefetch=0,
                grid=grid,
                in_specs=[pl.BlockSpec((tile_m, tile_r), lambda m, r: (m, r))],
                out_specs=pl.BlockSpec((tile_m, 1), lambda m, r: (m, 0)),
                scratch_shapes=[pltpu.VMEM((tile_m, 1), jnp.float32)],
            ),
            compiler_params=pltpu.CompilerParams(
                dimension_semantics=("parallel", "arbitrary"),
                vmem_limit_bytes=64 * 1024 * 1024,
            ),
        )(x2)
        return out2.reshape(out_shape_full)

    # ---- reduced axis is not last: flatten to [outer, R, inner] ------------
    outer = math.prod(shape[:ax]) if ax > 0 else 1
    inner = math.prod(shape[ax + 1:])
    x3 = x.reshape(outer, R, inner)

    # Lane tile (multiple of 128 or the full dim), then sublane (reduction)
    # tile, then outer tile, all within the per-input-tile element budget.
    # TODO(synk): if `inner` is huge and has no multiple-of-128 divisor, the
    # lane dim stays untiled and the tile may exceed the budget (rare).
    tile_i = _pick_tile(inner, min(4096, budget_elems), 128)
    max_r = max(8, min(1024, budget_elems // max(tile_i, 1)))
    tile_r = _pick_tile(R, max_r, 8)
    max_o = max(1, min(256, budget_elems // max(tile_r * tile_i, 1)))
    tile_o = _pick_tile(outer, max_o, 1)

    grid = (outer // tile_o, inner // tile_i, R // tile_r)
    kernel = functools.partial(_mean_mid_kernel, inv_n=inv_n)

    out2 = pl.pallas_call(
        kernel,
        out_shape=jax.ShapeDtypeStruct((outer, inner), x.dtype),
        grid_spec=pltpu.PrefetchScalarGridSpec(
            num_scalar_prefetch=0,
            grid=grid,
            in_specs=[
                pl.BlockSpec((tile_o, tile_r, tile_i), lambda o, i, r: (o, r, i))
            ],
            out_specs=pl.BlockSpec((tile_o, tile_i), lambda o, i, r: (o, i)),
            scratch_shapes=[pltpu.VMEM((tile_o, tile_i), jnp.float32)],
        ),
        compiler_params=pltpu.CompilerParams(
            dimension_semantics=("parallel", "parallel", "arbitrary"),
            vmem_limit_bytes=64 * 1024 * 1024,
        ),
    )(x3)
    return out2.reshape(out_shape_full)


class Mean:
    """JAX/Pallas mirror of the PyTorch Mean module."""

    def __init__(self, axis):
        self.axis = axis

    def __call__(self, x):
        return mean_pallas(x, self.axis)


if __name__ == "__main__":
    key = jax.random.PRNGKey(0)
    # [batch, seq, hidden] — ViT-style token pooling with Mean(axis=1).
    x = jax.random.normal(key, (2, 8, 32), dtype=jnp.float32)

    out = jax.block_until_ready(Mean(axis=1)(x))
    ref = jnp.mean(x, axis=1)
    assert out.shape == ref.shape and out.dtype == ref.dtype, (out.shape, ref.shape)
    assert bool(jnp.allclose(out, ref, atol=1e-5, rtol=1e-4)), "mismatch (axis=1)"

    # Last-axis (lane-reduction) path.
    out2 = jax.block_until_ready(Mean(axis=-1)(x))
    ref2 = jnp.mean(x, axis=-1)
    assert out2.shape == ref2.shape
    assert bool(jnp.allclose(out2, ref2, atol=1e-5, rtol=1e-4)), "mismatch (axis=-1)"

    # Leading-axis path.
    out3 = jax.block_until_ready(Mean(axis=0)(x))
    ref3 = jnp.mean(x, axis=0)
    assert out3.shape == ref3.shape
    assert bool(jnp.allclose(out3, ref3, atol=1e-5, rtol=1e-4)), "mismatch (axis=0)"

    # Moderate shape that exercises the tiled, multi-step accumulator path.
    xl = jax.random.normal(jax.random.PRNGKey(1), (2, 2048, 128), dtype=jnp.float32)
    out4 = jax.block_until_ready(Mean(axis=1)(xl))
    ref4 = jnp.mean(xl, axis=1)
    assert out4.shape == ref4.shape
    assert bool(jnp.allclose(out4, ref4, atol=1e-5, rtol=1e-4)), "mismatch (tiled)"

    # bf16 input: kernel accumulates in f32 and casts back at the end.
    xb = jax.random.normal(jax.random.PRNGKey(2), (2, 64, 128)).astype(jnp.bfloat16)
    out5 = jax.block_until_ready(Mean(axis=1)(xb))
    ref5 = jnp.mean(xb.astype(jnp.float32), axis=1).astype(jnp.bfloat16)
    assert out5.shape == ref5.shape and out5.dtype == jnp.bfloat16
    assert bool(
        jnp.allclose(out5.astype(jnp.float32), ref5.astype(jnp.float32),
                     atol=2e-2, rtol=2e-2)
    ), "mismatch (bf16)"

    print("KERNEL_OK")
</pallas_src>

<mosaic_0001>
module attributes {stable_mosaic.version = 11 : i64} {
  func.func @_mean_mid_kernel(%arg0: i32, %arg1: i32, %arg2: i32, %arg3: memref<2x8x32xf32, #tpu.memory_space<vmem>>, %arg4: memref<2x32xf32, #tpu.memory_space<vmem>>, %arg5: memref<2x32xf32, #tpu.memory_space<vmem>>) attributes {dimension_semantics = [#tpu.dimension_semantics<parallel>, #tpu.dimension_semantics<parallel>, #tpu.dimension_semantics<arbitrary>], iteration_bounds = array<i64: 1, 1, 1>, scalar_prefetch = 0 : i64, scratch_operands = 1 : i64, tpu.core_type = #tpu.core_type<tc>, window_params = [{transform_indices = @transform_0, window_bounds = array<i64: 2, 8, 32>}, {transform_indices = @transform_1, window_bounds = array<i64: 2, 32>}]} {
    %c0_i32 = arith.constant 0 : i32
    %0 = arith.cmpi eq, %arg2, %c0_i32 : i32
    %1 = arith.extui %0 : i1 to i32
    %c0_i32_0 = arith.constant 0 : i32
    %2 = arith.cmpi ne, %1, %c0_i32_0 : i32
    scf.if %2 {
      %cst_9 = arith.constant 0.000000e+00 : f32
      %11 = vector.broadcast %cst_9 : f32 to vector<2x32xf32>
      %c0_10 = arith.constant 0 : index
      %c0_11 = arith.constant 0 : index
      %12 = vector.load %arg5[%c0_10, %c0_11] : memref<2x32xf32, #tpu.memory_space<vmem>>, vector<2x32xf32>
      tpu.vector_store %arg5[%c0_10, %c0_11], %11 {strides = array<i32>} : memref<2x32xf32, #tpu.memory_space<vmem>>, vector<2x32xf32>,
    } else {
    }
    %c0 = arith.constant 0 : index
    %c0_1 = arith.constant 0 : index
    %3 = vector.load %arg5[%c0, %c0_1] : memref<2x32xf32, #tpu.memory_space<vmem>>, vector<2x32xf32>
    %c0_2 = arith.constant 0 : index
    %c0_3 = arith.constant 0 : index
    %c0_4 = arith.constant 0 : index
    %4 = vector.load %arg3[%c0_2, %c0_3, %c0_4] : memref<2x8x32xf32, #tpu.memory_space<vmem>>, vector<2x8x32xf32>
    %cst = arith.constant dense<0.000000e+00> : vector<2x32xf32>
    %5 = vector.multi_reduction <add>, %4, %cst [1] : vector<2x8x32xf32> to vector<2x32xf32>
    %6 = arith.addf %3, %5 : vector<2x32xf32>
    %c0_5 = arith.constant 0 : index
    %c0_6 = arith.constant 0 : index
    %7 = vector.load %arg5[%c0_5, %c0_6] : memref<2x32xf32, #tpu.memory_space<vmem>>, vector<2x32xf32>
    tpu.vector_store %arg5[%c0_5, %c0_6], %6 {strides = array<i32>} : memref<2x32xf32, #tpu.memory_space<vmem>>, vector<2x32xf32>,
    %c0_i32_7 = arith.constant 0 : i32
    %8 = arith.cmpi eq, %arg2, %c0_i32_7 : i32
    %9 = arith.extui %8 : i1 to i32
    %c0_i32_8 = arith.constant 0 : i32
    %10 = arith.cmpi ne, %9, %c0_i32_8 : i32
    scf.if %10 {
      %c0_9 = arith.constant 0 : index
      %c0_10 = arith.constant 0 : index
      %11 = vector.load %arg5[%c0_9, %c0_10] : memref<2x32xf32, #tpu.memory_space<vmem>>, vector<2x32xf32>
      %cst_11 = arith.constant 1.250000e-01 : f32
      %12 = vector.broadcast %cst_11 : f32 to vector<2x32xf32>
      %13 = arith.mulf %11, %12 : vector<2x32xf32>
      %c0_12 = arith.constant 0 : index
      %c0_13 = arith.constant 0 : index
      %14 = vector.load %arg4[%c0_12, %c0_13] : memref<2x32xf32, #tpu.memory_space<vmem>>, vector<2x32xf32>
      tpu.vector_store %arg4[%c0_12, %c0_13], %13 {strides = array<i32>} : memref<2x32xf32, #tpu.memory_space<vmem>>, vector<2x32xf32>,
    } else {
    }
    return
  }
  func.func @transform_0(%arg0: i32, %arg1: i32, %arg2: i32) -> (i32, i32, i32) {
    %c0_i32 = arith.constant 0 : i32
    return %arg0, %arg2, %arg1 : i32, i32, i32
  }
  func.func @transform_1(%arg0: i32, %arg1: i32, %arg2: i32) -> (i32, i32) {
    %c0_i32 = arith.constant 0 : i32
    return %arg0, %arg1 : i32, i32
  }
}

</mosaic_0001>

<bundles_post_ra>
// kernel: tpu_custom_call.1
= control target key start
LH: loop header
LB: loop body
LE: loop exit
PB: predicated region body
PF: predicated region fallthrough
CT: control target
= control target key end

     0   :  { %6 = vsyncpa [#allocation4], 0  ;;  %s161_s0 = inlined_call_operand.hbm [shape: f32[2,8,32], index: 0, kind: input, shape index: {}]   ;;  %s162_s1 = inlined_call_operand.hbm [shape: f32[2,32], index: 1, kind: output, shape index: {}]  }
   0x1   :  { %7 = vsyncpa [#allocation5], 0  ;;  %s12_s8 = sshll.u32 %s161_s0, 4  ;;  %s137_s9 = smov [#allocation3]   ;;  %s13_s8 = int_to_ptr.hbm [resolvable:$true] %s12_s8 }
   0x2   :  { %s14_s10 = sshll.u32 %s137_s9, 4  ;;  %s138_s11 = smov 128   ;;  %s15_s10 = int_to_ptr.vmem [resolvable:$true] %s14_s10 }
   0x3   :  { %s139_s12 = smov 8  }
   0x4   :  { %20 = dma.hbm_to_vmem [thread:$0]  %s13_s8, 256, %s15_s10, [#allocation4], %s138_s11, %s138_s11, %s139_s12  }
   0x5   :  { %133 = dma.done.wait [#allocation4], 256  }
   0x6   :  { %134 = vsyncadd [#allocation4], 4294967040  ;;  %vm29_vm0 = vcmask 254976   ;;  %v140_v0 = vmov 0.0   ;;  %vm34_vm1 = vcmask 261120   ;;  %v32_v1 = vld [vmem:[#allocation3] sm:$0xff] }
   0x7   :  { %30 = vst.msk [vmem:[#allocation2] sm:$0x3] %vm29_vm0, %v140_v0  ;;  %v33_v2 = vld [vmem:[#allocation3 + $0x8] sm:$0xff]  ;;  %v35_v3 = vsel %vm34_vm1, %v32_v1, 0.0  ;;  %vm51_vm2 = vcmask 1041409   ;;  %s141_s0 = smov [#allocation6]  }
   0x8   :  { %v42_v4 = vsel %vm34_vm1, %v33_v2, 0.0  ;;  %v36_v5 = vrot.slane %v35_v3, 4  ;;  %s68_s13 = sshll.u32 %s141_s0, 4  ;;  %s70_s16 = sshll.u32 %s162_s1, 4  ;;  %s69_s13 = int_to_ptr.vmem [resolvable:$true] %s68_s13  ;;  %s71_s16 = int_to_ptr.hbm [resolvable:$true] %s70_s16 }
   0x9   :  { %v43_v6 = vrot.slane %v42_v4, 4 }
   0xa   :  { %v37_v7 = vadd.f32 %v36_v5, %v35_v3 }
   0xb   :  { %v44_v8 = vadd.f32 %v43_v6, %v42_v4 }
   0xc   :  { %v38_v9 = vrot.slane %v37_v7, 2 }
   0xd   :  { %v45_v10 = vrot.slane %v44_v8, 2 }
   0xe   :  { %v39_v11 = vadd.f32 %v38_v9, %v37_v7  ;;  %v31_v15 = vld [vmem:[#allocation2] sm:$0x3] }
   0xf   :  { %v46_v12 = vadd.f32 %v45_v10, %v44_v8 }
  0x10   :  { %v40_v13 = vrot.slane %v39_v11, 1 }
  0x11   :  { %v47_v14 = vrot.slane %v46_v12, 1 }
  0x12   :  { %v41_v16 = vadd.f32 %v40_v13, %v39_v11 }
  0x13   :  { %v48_v17 = vadd.f32 %v47_v14, %v46_v12 }
  0x15   :  { %v52_v18 = vsel %vm51_vm2, %v48_v17, %v41_v16 }
  0x16   :  { %v54_v19 = vadd.f32 %v52_v18, %v31_v15 }
  0x18   :  { %56 = vst.msk [vmem:[#allocation2] sm:$0x3] %vm29_vm0, %v54_v19 }
  0x1f   :  { %v60_v20 = vld [vmem:[#allocation2] sm:$0x3] }
  0x20   :  { %v61_v21 = vmul.f32 0.125, %v60_v20 }
  0x22   :  { %62 = vst.msk [vmem:[#allocation6] sm:$0x3] %vm29_vm0, %v61_v21 }
  0x23   :  { %73 = dma.vmem_to_hbm [thread:$0]  %s69_s13, 32, %s71_s16, [#allocation5]  }
  0x24   :  { %135 = dma.done.wait [#allocation5], 32  }
  0x25   :  { %136 = vsyncadd [#allocation5], 4294967264 }
  0x26   :  { %78 = vsyncpa [#allocation4], 1 }
  0x27   :  { %79 = vsyncpa [#allocation5], 1 }

</bundles_post_ra>
